<compile_context>
chip_gen: v6e
topology: v6e:2x2x1
jax: 0.10.0
libtpu: 0.0.40
codegen_flags: <defaults>
</compile_context>

<pallas_src>
from typing import NamedTuple

import numpy as np
import jax
import jax.numpy as jnp
from jax.experimental import pallas as pl
from jax.experimental.pallas import tpu as pltpu


# ----------------------------------------------------------------------------
# Buffer construction -- mirrors LaplacianLoss.__init__ exactly.
# ----------------------------------------------------------------------------
def build_laplacian(nv: int, faces: np.ndarray) -> np.ndarray:
    laplacian = np.zeros([nv, nv], dtype=np.float32)
    laplacian[faces[:, 0], faces[:, 1]] = -1
    laplacian[faces[:, 1], faces[:, 0]] = -1
    laplacian[faces[:, 1], faces[:, 2]] = -1
    laplacian[faces[:, 2], faces[:, 1]] = -1
    laplacian[faces[:, 2], faces[:, 0]] = -1
    laplacian[faces[:, 0], faces[:, 2]] = -1
    r, c = np.diag_indices(laplacian.shape[0])
    laplacian[r, c] = -laplacian.sum(1)
    for i in range(nv):
        laplacian[i, :] /= laplacian[i, i]
    return laplacian


def _round_up(v: int, m: int) -> int:
    return (v + m - 1) // m * m


def _vmem_capacity_bytes() -> int:
    try:
        info = pltpu.get_tpu_info()
        cap = getattr(info, "vmem_capacity_bytes", None)
        if cap:
            return int(cap)
    except Exception:
        pass
    return 64 << 20  # conservative fallback: v7x per-TC physical VMEM


def _divisor_tiles(nv_pad: int):
    # All multiples of 128 that divide nv_pad (nv_pad is a multiple of 128).
    p = nv_pad // 128
    return [128 * d for d in range(1, p + 1) if p % d == 0]


# ----------------------------------------------------------------------------
# Once-per-mesh preparation (register_buffer analog): transpose + cast + pad.
# ----------------------------------------------------------------------------
class PreparedLaplacian(NamedTuple):
    lt: jax.Array   # (nv_pad, nv_pad) transposed Laplacian, target dtype
    nv: int
    nv_pad: int


def prepare_laplacian(laplacian, dtype=jnp.float32) -> PreparedLaplacian:
    lap = jnp.asarray(laplacian)
    nv = int(lap.shape[0])
    nv_pad = _round_up(nv, 128)
    lt = lap.T.astype(dtype)
    if nv_pad != nv:
        lt = jnp.zeros((nv_pad, nv_pad), dtype).at[:nv, :nv].set(lt)
    return PreparedLaplacian(lt=jax.device_put(lt), nv=nv, nv_pad=nv_pad)


# ----------------------------------------------------------------------------
# Pallas kernel:  Y2d = X2d @ L^T  (tiled over M / N / K), square, fold the
# n-tile's lane chunks into one lane-dense (M_tile, 128) partial-sum block.
# grid = (num_m, num_n, num_k); the K reduction is the last (arbitrary) axis.
# ----------------------------------------------------------------------------
def _laplacian_loss_kernel(x_ref, lt_ref, o_ref, acc_ref):
    k = pl.program_id(2)
    tk = lt_ref.shape[0]

    @pl.when(k == 0)
    def _():
        acc_ref[...] = jnp.zeros_like(acc_ref)

    # X2d is fully VMEM-resident for this M-tile; slice the current K chunk.
    off = pl.multiple_of(k * tk, 128)
    x_blk = x_ref[:, pl.ds(off, tk)].astype(lt_ref.dtype)
    acc_ref[...] += jnp.dot(x_blk, lt_ref[...],
                            preferred_element_type=jnp.float32)

    @pl.when(k == pl.num_programs(2) - 1)
    def _():
        sq = acc_ref[...] * acc_ref[...]           # (M_tile, tn), f32
        tn = sq.shape[-1]
        # Fold tn/128 lane chunks with plain vreg adds (static slices, no
        # cross-lane reduce, no masked stores).
        partial = sq[:, 0:128]
        for q in range(1, tn // 128):
            partial = partial + sq[:, q * 128:(q + 1) * 128]
        o_ref[0] = partial                         # lane-dense (M_tile, 128)


def laplacian_loss(prep: PreparedLaplacian, x: jnp.ndarray,
                   average: bool = False, l_tile_budget_bytes=None):
    NV, NV_pad = prep.nv, prep.nv_pad
    lt_p = prep.lt
    lap_itemsize = jnp.dtype(lt_p.dtype).itemsize

    B, NVx, C = x.shape
    assert NVx == NV, f"x has {NVx} vertices, Laplacian has {NV}"
    M = B * C

    vmem_cap = _vmem_capacity_bytes()
    if l_tile_budget_bytes is None:
        l_tile_budget_bytes = vmem_cap // 8   # per buffer (x2 for double-buffering)
    x_budget = vmem_cap // 16                 # per buffer for the resident X block

    # ---- tile selection (host-side static ints) -----------------------------
    tiles = _divisor_tiles(NV_pad)
    # n-tile: keep >= 2 n-tiles when possible (2-TC sharding on v7x), bounded acc.
    tn_cap = min(2048, NV_pad // 2) if NV_pad >= 256 else NV_pad
    tn = max([t for t in tiles if t <= tn_cap] or [128])
    # k-tile: as large as the per-buffer L budget allows.
    tk = max([t for t in tiles if t * tn * lap_itemsize <= l_tile_budget_bytes]
             or [128])
    num_n = NV_pad // tn
    num_k = NV_pad // tk

    # M tiling so huge B*C cannot blow VMEM (and gives real MXU rows as a bonus).
    m_tile_cap = max(8, min(512, (x_budget // (NV_pad * 4)) // 8 * 8))
    M_tile = min(_round_up(max(M, 1), 8), m_tile_cap)
    M_pad = _round_up(max(M, 1), M_tile)
    num_m = M_pad // M_tile

    # ---- per-call input prep (X is tiny: M x NV f32) ------------------------
    # Fold batch & channels into the matmul M dimension; NV is the lane axis:
    #   Y[b*C+c, v] = (X2d @ L^T)[b*C+c, v],  X2d[b*C+c, w] = x[b, w, c]
    x2d = jnp.transpose(x, (0, 2, 1)).reshape(M, NV).astype(jnp.float32)
    if (M_pad, NV_pad) != (M, NV):
        # Zero padding is a numerical no-op for a sum of squares.
        x2d_p = jnp.zeros((M_pad, NV_pad), jnp.float32).at[:M, :NV].set(x2d)
    else:
        x2d_p = x2d

    # VMEM usage from the *actual* tiles, with headroom; keep under physical.
    vmem_bytes = (2 * M_tile * NV_pad * 4          # resident X (double-buffered)
                  + 2 * tk * tn * lap_itemsize     # L tile (double-buffered)
                  + 2 * M_tile * 128 * 4           # output block
                  + M_tile * tn * 4)               # f32 accumulator
    vmem_limit = int(min(max(int(1.5 * vmem_bytes) + (4 << 20), 16 << 20),
                         vmem_cap - (4 << 20)))

    cost = pl.CostEstimate(
        flops=2 * M_pad * NV_pad * NV_pad,
        transcendentals=0,
        bytes_accessed=(num_m * NV_pad * NV_pad * lap_itemsize
                        + M_pad * NV_pad * 4
                        + num_n * M_pad * 128 * 4),
    )

    out = pl.pallas_call(
        _laplacian_loss_kernel,
        out_shape=jax.ShapeDtypeStruct((num_n, M_pad, 128), jnp.float32),
        grid=(num_m, num_n, num_k),
        in_specs=[
            # X2d: full NV width, constant block index across n/k -> DMA'd once
            # per M-tile and kept resident in VMEM.
            pl.BlockSpec((M_tile, NV_pad), lambda m, n, k: (m, 0)),
            # L^T: (k, n) tile -- the only large HBM stream.
            pl.BlockSpec((tk, tn), lambda m, n, k: (k, n)),
        ],
        # Lane-dense partial-sum block per (n, m), written once at k == last.
        out_specs=pl.BlockSpec((1, M_tile, 128), lambda m, n, k: (n, m, 0)),
        scratch_shapes=[pltpu.VMEM((M_tile, tn), jnp.float32)],
        compiler_params=pltpu.CompilerParams(
            dimension_semantics=("parallel", "parallel", "arbitrary"),
            vmem_limit_bytes=vmem_limit),
        cost_estimate=cost,
    )(x2d_p, lt_p)

    # (num_n, M_pad, 128) partial sums -> per-(batch, channel) -> per-batch.
    row_sums = jnp.sum(out, axis=(0, 2))[:M]          # (B*C,)
    per_batch = row_sums.reshape(B, C).sum(axis=1)    # (B,)

    # TODO(synk): production meshes (~7 nonzeros/row) want a sparse edge-list /
    # CSR formulation with scalar-prefetched neighbor indices (cuts HBM bytes
    # by ~NV/7); the dense tiled stream above is kept for exact fidelity with
    # the PyTorch reference buffer.
    if average:
        return jnp.sum(per_batch) / B
    return per_batch


# ----------------------------------------------------------------------------
# Demo / self-check
# ----------------------------------------------------------------------------
if __name__ == "__main__":
    NV = 300         # number of vertices (pads to 384 -> exercises padding)
    B = 2            # batch size
    C = 3            # xyz

    # Deterministic synthetic mesh connectivity (ring of triangles covering all
    # vertices, so every diagonal entry of the Laplacian is nonzero).
    faces = np.stack(
        [np.arange(NV), (np.arange(NV) + 1) % NV, (np.arange(NV) + 2) % NV],
        axis=1).astype(np.int64)
    lap_np = build_laplacian(NV, faces)

    key = jax.random.PRNGKey(0)
    x = jax.random.normal(key, (B, NV, C), dtype=jnp.float32)

    # Host float64 reference of the same forward pass.
    x64 = np.asarray(x, dtype=np.float64)
    lap64 = lap_np.astype(np.float64)
    y_ref = np.einsum("vw,bwc->bvc", lap64, x64)
    ref = (y_ref ** 2).sum(axis=(1, 2))              # (B,)

    # --- f32 Laplacian path (default) ---
    prep_f32 = prepare_laplacian(lap_np, dtype=jnp.float32)
    loss = jax.block_until_ready(laplacian_loss(prep_f32, x, average=False))
    assert loss.shape == (B,)
    np.testing.assert_allclose(np.asarray(loss), ref, rtol=1e-4, atol=1e-3)

    loss_avg = jax.block_until_ready(laplacian_loss(prep_f32, x, average=True))
    np.testing.assert_allclose(np.asarray(loss_avg), ref.sum() / B,
                               rtol=1e-4, atol=1e-3)

    # --- force a small L-tile budget to exercise the multi-(n,k)-tile path ---
    loss_multi = jax.block_until_ready(
        laplacian_loss(prep_f32, x, average=False,
                       l_tile_budget_bytes=128 * 128 * 4))
    np.testing.assert_allclose(np.asarray(loss_multi), ref, rtol=1e-4, atol=1e-3)

    # --- bf16 Laplacian path (halved L HBM traffic; ~1e-3 relative error) ---
    prep_bf16 = prepare_laplacian(lap_np, dtype=jnp.bfloat16)
    loss_bf16 = jax.block_until_ready(laplacian_loss(prep_bf16, x, average=False))
    np.testing.assert_allclose(np.asarray(loss_bf16), ref, rtol=3e-2, atol=5e-1)

    print("KERNEL_OK")
</pallas_src>

<mosaic_0001>
module attributes {stable_mosaic.version = 11 : i64} {
  func.func @_laplacian_loss_kernel(%arg0: i32, %arg1: i32, %arg2: i32, %arg3: memref<8x384xf32, #tpu.memory_space<vmem>>, %arg4: memref<384x128xf32, #tpu.memory_space<vmem>>, %arg5: memref<1x8x128xf32, #tpu.memory_space<vmem>>, %arg6: memref<8x128xf32, #tpu.memory_space<vmem>>) attributes {dimension_semantics = [#tpu.dimension_semantics<parallel>, #tpu.dimension_semantics<parallel>, #tpu.dimension_semantics<arbitrary>], iteration_bounds = array<i64: 1, 3, 1>, scalar_prefetch = 0 : i64, scratch_operands = 1 : i64, tpu.core_type = #tpu.core_type<tc>, window_params = [{transform_indices = @transform_0, window_bounds = array<i64: 8, 384>}, {transform_indices = @transform_1, window_bounds = array<i64: 384, 128>}, {transform_indices = @transform_2, window_bounds = array<i64: 1, 8, 128>}]} {
    %c0_i32 = arith.constant 0 : i32
    %0 = arith.cmpi eq, %arg2, %c0_i32 : i32
    %1 = arith.extui %0 : i1 to i32
    %c0_i32_0 = arith.constant 0 : i32
    %2 = arith.cmpi ne, %1, %c0_i32_0 : i32
    scf.if %2 {
      %cst_9 = arith.constant 0.000000e+00 : f32
      %15 = vector.broadcast %cst_9 : f32 to vector<8x128xf32>
      %c0_10 = arith.constant 0 : index
      %c0_11 = arith.constant 0 : index
      %16 = vector.load %arg6[%c0_10, %c0_11] : memref<8x128xf32, #tpu.memory_space<vmem>>, vector<8x128xf32>
      tpu.vector_store %arg6[%c0_10, %c0_11], %15 {strides = array<i32>} : memref<8x128xf32, #tpu.memory_space<vmem>>, vector<8x128xf32>,
    } else {
    }
    %c384_i32 = arith.constant 384 : i32
    %3 = arith.muli %arg2, %c384_i32 : i32
    %4 = tpu.assume_multiple %3, 128 : i32
    %c0 = arith.constant 0 : index
    %5 = arith.index_cast %4 : i32 to index
    %6 = vector.load %arg3[%c0, %5] : memref<8x384xf32, #tpu.memory_space<vmem>>, vector<8x384xf32>
    %c0_1 = arith.constant 0 : index
    %c0_2 = arith.constant 0 : index
    %7 = vector.load %arg6[%c0_1, %c0_2] : memref<8x128xf32, #tpu.memory_space<vmem>>, vector<8x128xf32>
    %c0_3 = arith.constant 0 : index
    %c0_4 = arith.constant 0 : index
    %8 = vector.load %arg4[%c0_3, %c0_4] : memref<384x128xf32, #tpu.memory_space<vmem>>, vector<384x128xf32>
    %cst = arith.constant dense<0.000000e+00> : vector<8x128xf32>
    %9 = tpu.matmul %6, %8, %cst {dimension_numbers = #tpu.dot_dimension_numbers<[1], [0], [0], [1], [0, 0, 1, 1], [], []>} : vector<8x384xf32>, vector<384x128xf32>, vector<8x128xf32> -> vector<8x128xf32>
    %10 = arith.addf %7, %9 : vector<8x128xf32>
    %c0_5 = arith.constant 0 : index
    %c0_6 = arith.constant 0 : index
    %11 = vector.load %arg6[%c0_5, %c0_6] : memref<8x128xf32, #tpu.memory_space<vmem>>, vector<8x128xf32>
    tpu.vector_store %arg6[%c0_5, %c0_6], %10 {strides = array<i32>} : memref<8x128xf32, #tpu.memory_space<vmem>>, vector<8x128xf32>,
    %c0_i32_7 = arith.constant 0 : i32
    %12 = arith.cmpi eq, %arg2, %c0_i32_7 : i32
    %13 = arith.extui %12 : i1 to i32
    %c0_i32_8 = arith.constant 0 : i32
    %14 = arith.cmpi ne, %13, %c0_i32_8 : i32
    scf.if %14 {
      %c0_9 = arith.constant 0 : index
      %c0_10 = arith.constant 0 : index
      %15 = vector.load %arg6[%c0_9, %c0_10] : memref<8x128xf32, #tpu.memory_space<vmem>>, vector<8x128xf32>
      %c0_11 = arith.constant 0 : index
      %c0_12 = arith.constant 0 : index
      %16 = vector.load %arg6[%c0_11, %c0_12] : memref<8x128xf32, #tpu.memory_space<vmem>>, vector<8x128xf32>
      %17 = arith.mulf %15, %16 : vector<8x128xf32>
      %c0_13 = arith.constant 0 : index
      %c0_14 = arith.constant 0 : index
      %c0_15 = arith.constant 0 : index
      %18 = vector.load %arg5[%c0_13, %c0_14, %c0_15] : memref<1x8x128xf32, #tpu.memory_space<vmem>>, vector<1x8x128xf32>
      %19 = vector.shape_cast %18 : vector<1x8x128xf32> to vector<8x128xf32>
      %20 = vector.shape_cast %17 : vector<8x128xf32> to vector<1x8x128xf32>
      tpu.vector_store %arg5[%c0_13, %c0_14, %c0_15], %20 {strides = array<i32>} : memref<1x8x128xf32, #tpu.memory_space<vmem>>, vector<1x8x128xf32>,
    } else {
    }
    return
  }
  func.func @transform_0(%arg0: i32, %arg1: i32, %arg2: i32) -> (i32, i32) {
    %c0_i32 = arith.constant 0 : i32
    %c0_i32_0 = arith.constant 0 : i32
    return %arg0, %c0_i32 : i32, i32
  }
  func.func @transform_1(%arg0: i32, %arg1: i32, %arg2: i32) -> (i32, i32) {
    %c0_i32 = arith.constant 0 : i32
    return %arg2, %arg1 : i32, i32
  }
  func.func @transform_2(%arg0: i32, %arg1: i32, %arg2: i32) -> (i32, i32, i32) {
    %c0_i32 = arith.constant 0 : i32
    %c0_i32_0 = arith.constant 0 : i32
    return %arg1, %arg0, %c0_i32 : i32, i32, i32
  }
}

</mosaic_0001>

<bundles_post_ra>
// kernel: tpu_custom_call.1
= control target key start
LH: loop header
LB: loop body
LE: loop exit
PB: predicated region body
PF: predicated region fallthrough
CT: control target
= control target key end

     0   :  { %7 = vsyncpa [#allocation4], 0  ;;  %s1106_s0 = inlined_call_operand.hbm [shape: f32[8,384], index: 0, kind: input, shape index: {}]   ;;  %s1107_s1 = inlined_call_operand.hbm [shape: f32[384,384], index: 1, kind: input, shape index: {}]   ;;  %s1108_s2 = inlined_call_operand.hbm [shape: f32[3,8,128], index: 2, kind: output, shape index: {}]  }
   0x1   :  { %8 = vsyncpa [#allocation7], 0 }
   0x2   :  { %10 = vsyncpa [#allocation7 + $0x1], 0 }
   0x3   :  { %11 = vsyncpa [#allocation5], 0 }
   0x4   :  { %13 = vsyncpa [#allocation5 + $0x1], 0  ;;  %s877_s9 = smov 0   ;;  %s879_s10 = smov 0  }
   0x5   :  { %s881_s11 = smov 0   ;;  %s883_s12 = smov 0  }
   0x6   :  { %s885_s13 = smov 0   ;;  %s887_s14 = smov 0  }
   0x7 LB: > { %s534_s15 = sadd.s32 4294967295, %s852_s14   ;;  %s535_s16 = sadd.s32 4294967294, %s852_s14   ;;  %s852_s14 = sphi %s887_s14, %s19_s14   ;;  %s848_s13 = sphi %s885_s13, %s1126_s13   ;;  %s844_s12 = sphi %s883_s12, %s1125_s12   ;;  %s840_s11 = sphi %s881_s11, %s1124_s11   ;;  %s836_s10 = sphi %s879_s10, %s1123_s10   ;;  %s832_s9 = sphi %s877_s9, %s1122_s9  }
   0x8   : > { %s73_s17 = sadd.s32 1, %s840_s11  ;;  %p80_p0 = scmp.ne.s32.totalorder %s840_s11, %s836_s10 }
   0x9   : > { %p81_p1 = scmp.eq.s32.totalorder %s852_s14, 0  ;;  %p86_p2 = scmp.ne.s32.totalorder %s836_s10, %s832_s9 }
   0xa   : > { %p915_p3 = scmp.eq.s32.totalorder %s534_s15, 0  ;;  %p112_p4 = scmp.eq.s32.totalorder %s534_s15, 2 }
   0xb   : > { %p919_p5 = por %p81_p1, %p80_p0  ;;  %p118_p6 = scmp.eq.s32.totalorder %s535_s16, 2 }
   0xc   : > { %p925_p7 = por %p915_p3, %p86_p2  ;;  %p929_p8 = por %p112_p4, %p80_p0 }
   0xd   : > { %p933_p9 = por %p118_p6, %p86_p2  ;;  %p536_p10 = scmp.ge.s32.totalorder %s852_s14, 1 }
   0xe   : > { %s1113_s20 = scalar_select %p925_p7, 1, 0 }
   0xf   : > { %s1114_s21 = scalar_select %p929_p8, 1, 0 }
  0x10   : > { %s1115_s22 = scalar_select %p933_p9, 1, 0 }
  0x11   : > { %p125_p11 = scmp.lt.s32.totalorder %s852_s14, 4  ;;  %s854_s24 = smov [#allocation3]  }
  0x12   : > { %s141_s25 = sshll.u32 %s854_s24, 4  ;;  %p657_p13 = scmp.lt.s32.totalorder %s852_s14, 3  ;;  %s142_s25 = int_to_ptr.vmem [resolvable:$true] %s141_s25 }
  0x13   : > { %p939_p12 = pnand %p536_p10, %p125_p11  ;;  %s34_s28 = sadd.s32 1, %s848_s13 }
  0x14   : > { %p948_p1 = pnand %p657_p13, %p919_p5  ;;  %p36_p4 = scmp.ge.s32.totalorder %s34_s28, 3 }
  0x15   : > { %p644_p0 = pneg %p939_p12  ;;  %s152_s29 = sand.u32 1, %s840_s11  }
  0x16   : > { %s725_s30 = scalar_lea.vmem %s142_s25, 384  ;;  %p733_p8 = scmp.lt.s32.totalorder %s142_s25, %s142_s25 }
  0x17   : > { %p954_p2 = pnand %p644_p0, %p915_p3  ;;  %p726_p10 = scmp.ne.s32.totalorder %s142_s25, %s725_s30 }
  0x18   : > { %p734_p5 = scmp.lt.s32.totalorder %s725_s30, %s725_s30 }
  0x19   : > { %p716_p6 = pneg %p954_p2 }
  0x1a   : > { %p735_p13 = por %p734_p5, %p733_p8 }
  0x1b   : > { %p728_p11 = pnand %p726_p10, %p716_p6 }
  0x1d   : > { %p729_p9 = pneg %p728_p11 }
  0x1f   : > { %p736_p7 = pnand %p735_p13, %p729_p9 }
  0x21   : > { %739 = shalt.err (!%p736_p7)
}
  0x22   : > { %647 = dma.hbm_to_vmem [thread:$0]  (!%p954_p2), %s1106_s0, 384, %s142_s25, [#allocation4]  }
  0x23   : > { %s1128_s28 = smov (%p36_p4, %s34_s28), 0  ;;  %s634_s5 = smul.u32 384, %s152_s29 }
  0x24   : > { %s69_s6 = ssub.s32 %s848_s13, %s1128_s28  ;;  %s539_s7 = sshll.u32 %s848_s13, 7 }
  0x25   : > { %p71_p8 = scmp.eq.s32.totalorder %s69_s6, 0  ;;  %s164_s16 = scalar_lea.hbm %s1107_s1, %s539_s7 }
  0x26   : > { %s156_s19 = scalar_lea.vmem [#allocation6], %s634_s5  ;;  %s153_s30 = scalar_lea.sflag [#allocation7], %s152_s29 }
  0x27   : > { %s165_s24 = sshll.u32 %s156_s19, 4  ;;  %p742_p7 = pneg %p948_p1  ;;  %s166_s24 = int_to_ptr.vmem [resolvable:$true] %s165_s24 }
  0x28   : > { %s978_s27 = scalar_select %p71_p8, %s840_s11, %s73_s17  }
  0x29   : > { %s753_s25 = scalar_lea.vmem %s166_s24, 6144  ;;  %s855_s3 = smov [#allocation6]  }
  0x2a   : > { %p754_p9 = scmp.ne.s32.totalorder %s166_s24, %s753_s25  ;;  %s758_s4 = sshll.u32 %s855_s3, 4  ;;  %s759_s4 = int_to_ptr.vmem [resolvable:$false] %s758_s4 }
  0x2b   : > { %s760_s6 = scalar_lea.vmem %s759_s4, 12288  ;;  %p761_p4 = scmp.lt.s32.totalorder %s166_s24, %s759_s4 }
  0x2c   : > { %p756_p0 = pnand %p754_p9, %p742_p7  ;;  %p762_p6 = scmp.lt.s32.totalorder %s760_s6, %s753_s25 }
  0x2e   : > { %p757_p2 = pneg %p756_p0  ;;  %p763_p10 = por %p762_p6, %p761_p4 }
  0x30   : > { %p764_p11 = pnand %p763_p10, %p757_p2 }
  0x32   : > { %767 = shalt.err (!%p764_p11)
}
  0x33   : > { %s856_s5 = smov 384   ;;  %s857_s17 = smov 128  }
  0x34   : > { %s858_s7 = smov 8   ;;  %177 = sbr.rel (%p939_p12) target bundleno = 311 (0x137), region = 28 }
  0x35   : > { %651 = dma.hbm_to_vmem [thread:$0]  (!%p948_p1), %s164_s16, 6144, %s166_s24, %s153_s30, %s856_s5, %s857_s17, %s858_s7  }
  0x39   : > { %819 = dma.done.wait (%p915_p3), [#allocation4], 384  }
  0x3a   : > { %821 = vsyncadd (%p915_p3), [#allocation4], 4294966912  ;;  %s991_s29 = sand.u32 1, %s836_s10   ;;  %p1119_p1 = scmp.ne.s32.totalorder %s1113_s20, 0 }
  0x3b   : > { %s635_s8 = smul.u32 384, %s991_s29  ;;  %s184_s15 = scalar_lea.sflag [#allocation7], %s991_s29 }
  0x3d   : > { %s995_s19 = scalar_lea.vmem [#allocation6], %s635_s8 }
  0x3e   : > { %823 = dma.done.wait (%p1119_p1), %s184_s15, 6144  }
  0x3f   : > { %825 = vsyncadd (%p1119_p1), %s184_s15, 4294961152  ;;  %v859_v0 = vmov 0.0   ;;  %vm860_vm0 = vmmov 0   ;;  %v254_v1 = vld [vmem:[%s995_s19 + $0xf8] sm:$0xff]  ;;  %v253_v3 = vld [vmem:[%s995_s19 + $0xf0] sm:$0xff]  ;;  %s542_s18 = sshll.u32 %s991_s29, 3 }
  0x40   : > { %599 = vmatprep.subr.mxu1 %v859_v0  ;;  %631 = vmatprep.mubr.msk.f32.mxu1 %vm860_vm0, %v859_v0  ;;  %v238_v2 = vld [vmem:[%s995_s19 + $0x78] sm:$0xff]  ;;  %v237_v4 = vld [vmem:[%s995_s19 + $0x70] sm:$0xff]  ;;  %v252_v6 = vld [vmem:[%s995_s19 + $0xe8] sm:$0xff]  ;;  %s544_s20 = sshll.u32 %s844_s12, 7  ;;  %s207_s23 = scalar_lea.vmem [#allocation8], %s542_s18 }
  0x41   : > { %547 = vmatprep.subr.mxu0 %v254_v1  ;;  %v270_v5 = vld [vmem:[%s995_s19 + $0x178] sm:$0xff]  ;;  %v269_v7 = vld [vmem:[%s995_s19 + $0x170] sm:$0xff]  ;;  %v236_v8 = vld [vmem:[%s995_s19 + $0x68] sm:$0xff]  ;;  %s434_s26 = sshll.u32 %s207_s23, 4  ;;  %s432_s30 = scalar_lea.hbm %s1108_s2, %s544_s20  ;;  %s435_s26 = int_to_ptr.vmem [resolvable:$true] %s434_s26 }
  0x42   : > { %548 = vmatpush3.msra.mxu0 %v238_v2  ;;  %600 = vmatpush3.msra.mxu1 %v270_v5  ;;  %v268_v9 = vld [vmem:[%s995_s19 + $0x168] sm:$0xff]  ;;  %v251_v10 = vld [vmem:[%s995_s19 + $0xe0] sm:$0xff]  ;;  %v250_v13 = vld [vmem:[%s995_s19 + $0xd8] sm:$0xff]  ;;  %s420_s25 = scalar_lea.sflag [#allocation5], %s991_s29  ;;  %s768_s3 = scalar_lea.vmem %s435_s26, 128 }
  0x43   : > { %549 = vmatprep.subr.mxu0 %v253_v3  ;;  %601 = vmatprep.subr.mxu1 %v859_v0  ;;  %v235_v11 = vld [vmem:[%s995_s19 + $0x60] sm:$0xff]  ;;  %v234_v14 = vld [vmem:[%s995_s19 + $0x58] sm:$0xff]  ;;  %v249_v16 = vld [vmem:[%s995_s19 + $0xd0] sm:$0xff]  ;;  %p769_p3 = scmp.ne.s32.totalorder %s435_s26, %s768_s3  ;;  %p1120_p12 = scmp.ne.s32.totalorder %s1114_s21, 0 }
  0x44   : > { %550 = vmatpush3.msra.mxu0 %v237_v4  ;;  %602 = vmatpush3.msra.mxu1 %v269_v7  ;;  %v267_v12 = vld [vmem:[%s995_s19 + $0x160] sm:$0xff]  ;;  %v266_v15 = vld [vmem:[%s995_s19 + $0x158] sm:$0xff]  ;;  %v233_v17 = vld [vmem:[%s995_s19 + $0x50] sm:$0xff]  ;;  %s861_s4 = smov [#allocation8]  }
  0x45   : > { %551 = vmatprep.subr.mxu0 %v252_v6  ;;  %603 = vmatprep.subr.mxu1 %v859_v0  ;;  %v265_v18 = vld [vmem:[%s995_s19 + $0x150] sm:$0xff]  ;;  %v248_v19 = vld [vmem:[%s995_s19 + $0xc8] sm:$0xff]  ;;  %v247_v22 = vld [vmem:[%s995_s19 + $0xc0] sm:$0xff]  ;;  %p770_p5 = pnand %p769_p3, %p1120_p12  ;;  %s772_s6 = sshll.u32 %s861_s4, 4  ;;  %s773_s6 = int_to_ptr.vmem [resolvable:$false] %s772_s6 }
  0x46   : > { %552 = vmatpush3.msra.mxu0 %v236_v8  ;;  %604 = vmatpush3.msra.mxu1 %v268_v9  ;;  %v232_v20 = vld [vmem:[%s995_s19 + $0x48] sm:$0xff]  ;;  %v231_v23 = vld [vmem:[%s995_s19 + $0x40] sm:$0xff]  ;;  %v246_v25 = vld [vmem:[%s995_s19 + $0xb8] sm:$0xff]  ;;  %s774_s12 = scalar_lea.vmem %s773_s6, 256  ;;  %p775_p8 = scmp.lt.s32.totalorder %s435_s26, %s773_s6 }
  0x47   : > { %553 = vmatprep.subr.mxu0 %v251_v10  ;;  %605 = vmatprep.subr.mxu1 %v859_v0  ;;  %v264_v21 = vld [vmem:[%s995_s19 + $0x148] sm:$0xff]  ;;  %v263_v24 = vld [vmem:[%s995_s19 + $0x140] sm:$0xff]  ;;  %v230_v26 = vld [vmem:[%s995_s19 + $0x38] sm:$0xff]  ;;  %p771_p13 = pneg %p770_p5  ;;  %p776_p7 = scmp.lt.s32.totalorder %s774_s12, %s768_s3 }
  0x48   : > { %554 = vmatpush3.msra.mxu0 %v235_v11  ;;  %606 = vmatpush3.msra.mxu1 %v267_v12  ;;  %v262_v27 = vld [vmem:[%s995_s19 + $0x138] sm:$0xff]  ;;  %v245_v28 = vld [vmem:[%s995_s19 + $0xb0] sm:$0xff]  ;;  %v244_v31 = vld [vmem:[%s995_s19 + $0xa8] sm:$0xff] }
  0x49   : > { %555 = vmatprep.subr.mxu0 %v250_v13  ;;  %607 = vmatprep.subr.mxu1 %v859_v0  ;;  %v229_v29 = vld [vmem:[%s995_s19 + $0x30] sm:$0xff]  ;;  %v228_v32 = vld [vmem:[%s995_s19 + $0x28] sm:$0xff]  ;;  %v243_v34 = vld [vmem:[%s995_s19 + $0xa0] sm:$0xff]  ;;  %p777_p9 = por %p776_p7, %p775_p8 }
  0x4a   : > { %556 = vmatpush3.msra.mxu0 %v234_v14  ;;  %608 = vmatpush3.msra.mxu1 %v266_v15  ;;  %v261_v30 = vld [vmem:[%s995_s19 + $0x130] sm:$0xff]  ;;  %v260_v33 = vld [vmem:[%s995_s19 + $0x128] sm:$0xff]  ;;  %v227_v35 = vld [vmem:[%s995_s19 + $0x20] sm:$0xff] }
  0x4b   : > { %557 = vmatprep.subr.mxu0 %v249_v16  ;;  %609 = vmatprep.subr.mxu1 %v859_v0  ;;  %v259_v36 = vld [vmem:[%s995_s19 + $0x120] sm:$0xff]  ;;  %v242_v37 = vld [vmem:[%s995_s19 + $0x98] sm:$0xff]  ;;  %v241_v40 = vld [vmem:[%s995_s19 + $0x90] sm:$0xff]  ;;  %p778_p0 = pnand %p777_p9, %p771_p13 }
  0x4c   : > { %558 = vmatpush3.msra.mxu0 %v233_v17  ;;  %610 = vmatpush3.msra.mxu1 %v265_v18  ;;  %v226_v38 = vld [vmem:[%s995_s19 + $0x18] sm:$0xff]  ;;  %v225_v41 = vld [vmem:[%s995_s19 + $0x10] sm:$0xff]  ;;  %v240_v43 = vld [vmem:[%s995_s19 + $0x88] sm:$0xff] }
  0x4d   : > { %559 = vmatprep.subr.mxu0 %v248_v19  ;;  %611 = vmatprep.subr.mxu1 %v859_v0  ;;  %v258_v39 = vld [vmem:[%s995_s19 + $0x118] sm:$0xff]  ;;  %v257_v42 = vld [vmem:[%s995_s19 + $0x110] sm:$0xff]  ;;  %v224_v44 = vld [vmem:[%s995_s19 + $0x8] sm:$0xff] }
  0x4e   : > { %560 = vmatpush3.msra.mxu0 %v232_v20  ;;  %612 = vmatpush3.msra.mxu1 %v264_v21  ;;  %v220_v45 = vld [vmem:[#allocation3 + $0x8] sm:$0xff]  ;;  %v239_v46 = vld [vmem:[%s995_s19 + $0x80] sm:$0xff]  ;;  %v256_v47 = vld [vmem:[%s995_s19 + $0x108] sm:$0xff] }
  0x4f   : > { %561 = vmatprep.subr.mxu0 %v247_v22  ;;  %613 = vmatprep.subr.mxu1 %v859_v0  ;;  %v223_v48 = vld [vmem:[%s995_s19] sm:$0xff]  ;;  %v219_v49 = vld [vmem:[#allocation3] sm:$0xff]  ;;  %v221_v51 = vld [vmem:[#allocation3 + $0x10] sm:$0xff] }
  0x50   : > { %562 = vmatpush3.msra.mxu0 %v231_v23  ;;  %614 = vmatpush3.msra.mxu1 %v263_v24  ;;  %v255_v50 = vld [vmem:[%s995_s19 + $0x100] sm:$0xff] }
  0x51   : > { %563 = vmatprep.subr.mxu0 %v246_v25  ;;  %615 = vmatprep.subr.mxu1 %v859_v0 }
  0x52   : > { %564 = vmatpush3.msra.mxu0 %v230_v26  ;;  %616 = vmatpush3.msra.mxu1 %v262_v27 }
  0x53   : > { %565 = vmatprep.subr.mxu0 %v245_v28  ;;  %617 = vmatprep.subr.mxu1 %v859_v0 }
  0x54   : > { %566 = vmatpush3.msra.mxu0 %v229_v29  ;;  %618 = vmatpush3.msra.mxu1 %v261_v30 }
  0x55   : > { %567 = vmatprep.subr.mxu0 %v244_v31  ;;  %619 = vmatprep.subr.mxu1 %v859_v0 }
  0x56   : > { %568 = vmatpush3.msra.mxu0 %v228_v32  ;;  %620 = vmatpush3.msra.mxu1 %v260_v33 }
  0x57   : > { %569 = vmatprep.subr.mxu0 %v243_v34  ;;  %621 = vmatprep.subr.mxu1 %v859_v0 }
  0x58   : > { %570 = vmatpush3.msra.mxu0 %v227_v35  ;;  %622 = vmatpush3.msra.mxu1 %v259_v36 }
  0x59   : > { %571 = vmatprep.subr.mxu0 %v242_v37  ;;  %623 = vmatprep.subr.mxu1 %v859_v0 }
  0x5a   : > { %572 = vmatpush3.msra.mxu0 %v226_v38  ;;  %624 = vmatpush3.msra.mxu1 %v258_v39 }
  0x5b   : > { %573 = vmatprep.subr.mxu0 %v241_v40  ;;  %625 = vmatprep.subr.mxu1 %v859_v0 }
  0x5c   : > { %574 = vmatpush3.msra.mxu0 %v225_v41  ;;  %626 = vmatpush3.msra.mxu1 %v257_v42 }
  0x5d   : > { %575 = vmatprep.subr.mxu0 %v240_v43  ;;  %627 = vmatprep.subr.mxu1 %v859_v0 }
  0x5e   : > { %576 = vmatpush3.msra.mxu0 %v224_v44  ;;  %335 = vmatprep.mubr.f32.mxu0 %v220_v45 }
  0x5f   : > { %577 = vmatprep.subr.mxu0 %v239_v46  ;;  %628 = vmatpush3.msra.mxu1 %v256_v47 }
  0x60   : > { %578 = vmatpush3.msra.mxu0 %v223_v48  ;;  %629 = vmatprep.subr.mxu1 %v859_v0 }
  0x61   : > { %336 = vmatmul.mubr.f32.vlgmr.msra.gmra.mxu0 %v219_v49  ;;  %630 = vmatpush3.msra.mxu1 %v255_v50 }
  0x62   : > { %632 = vmatmul.mubr.f32.vlgmr.msra.gmra.mxu1 %v221_v51 }
 0x121   : > { %v579_v52 = vpop.f32.mrf.mxu0 }
 0x122   : > { %v407_v53 = vpop.f32.mrf.mxu1 }
 0x123   : > { %v580_v54 = vpop.f32.mrf.mxu0 }
 0x124   : > { %v581_v55 = vadd.f32 %v580_v54, %v579_v52  ;;  %v633_v56 = vpop.f32.mrf.mxu1 }
 0x126   : > { %v408_v57 = vadd.f32 %v581_v55, %v407_v53 }
 0x128   : > { %v417_v58 = vmul.f32 %v408_v57, %v408_v57 }
 0x12a   : > { %418 = vst [vmem:[%s207_s23] sm:$0xff] %v417_v58 }
 0x12b   : > { %781 = shalt.err (!%p778_p0)
}
 0x12c   : > { %s782_s5 = scalar_lea.hbm %s432_s30, 128  ;;  %s786_s29 = scalar_lea.hbm %s1108_s2, 384 }
 0x12d   : > { %p783_p2 = scmp.ne.s32.totalorder %s432_s30, %s782_s5  ;;  %p787_p10 = scmp.lt.s32.totalorder %s432_s30, %s1108_s2 }
 0x12e   : > { %p788_p11 = scmp.lt.s32.totalorder %s786_s29, %s782_s5 }
 0x12f   : > { %p784_p4 = pnand %p783_p2, %p1120_p12 }
 0x130   : > { %p789_p1 = por %p788_p11, %p787_p10 }
 0x131   : > { %p785_p6 = pneg %p784_p4 }
 0x133   : > { %p790_p3 = pnand %p789_p1, %p785_p6 }
 0x135   : > { %793 = shalt.err (!%p790_p3)
}
 0x136   : > { %642 = dma.vmem_to_hbm [thread:$0]  (%p1120_p12), %s435_s26, 128, %s432_s30, %s420_s25  }
 0x137 PF: > { %p659_p5 = scmp.ge.s32.totalorder %s852_s14, 2  ;;  %s446_s19 = sand.u32 1, %s832_s9  }
 0x138   : > { %p1121_p13 = scmp.ne.s32.totalorder %s1115_s22, 0  ;;  %s447_s18 = scalar_lea.sflag [#allocation5], %s446_s19 }
 0x13a   : > { %p653_p8 = pnand %p659_p5, %p1121_p13 }
 0x13c   : > { %p654_p7 = pneg %p653_p8 }
 0x13e   : > { %827 = dma.done.wait (%p654_p7), %s447_s18, 128  }
 0x13f   : > { %829 = vsyncadd (%p654_p7), %s447_s18, 4294967168  ;;  %s19_s14 = sadd.s32 1, %s852_s14   ;;  %s1122_s9 = smov %s836_s10 }
 0x140   : > { %p16_p9 = scmp.ge.s32.totalorder %s19_s14, 5   ;;  %s1123_s10 = smov %s840_s11 }
 0x141   : > { %s1124_s11 = smov %s978_s27  ;;  %s1125_s12 = smov %s848_s13 }
 0x142   : > { %s1126_s13 = smov %s1128_s28  ;;  %18 = sbr.rel (!%p16_p9) target bundleno = 7 (0x7), region = 88 }
 0x147   :  { %452 = vsyncpa [#allocation4], 1 }
 0x148   :  { %454 = vsyncpa [#allocation4 + $0x1], 1 }
 0x149   :  { %455 = vsyncpa [#allocation7], 1 }
 0x14a   :  { %457 = vsyncpa [#allocation7 + $0x1], 1 }
 0x14b   :  { %458 = vsyncpa [#allocation5], 1 }
 0x14c   :  { %460 = vsyncpa [#allocation5 + $0x1], 1 }

</bundles_post_ra>
